<compile_context>
chip_gen: v7x
topology: tpu7x:2x2x1
jax: 0.10.0
libtpu: 0.0.40
codegen_flags: <defaults>
</compile_context>

<pallas_src>
import jax
import jax.numpy as jnp
from jax.experimental import pallas as pl
from jax.experimental.pallas import tpu as pltpu


# ------------------------- Pallas kernel -------------------------
def decoder_kernel(odo_ref, h0_ref, c0_ref,
                   w_mlp_ref, b_mlp_ref,
                   w_ih_ref, w_hh_ref, b_gates_ref,
                   w_out_ref, b_out_ref,
                   out_ref):
    B, H = h0_ref.shape
    TB = odo_ref.shape[0]
    T = TB // B

    # ---- hoisted, time-invariant input path: two batched matmuls over T*B rows ----
    m_all = jnp.maximum(
        jnp.dot(odo_ref[...], w_mlp_ref[...], preferred_element_type=jnp.float32)
        + b_mlp_ref[...], 0.0)                                    # (T*B, M)
    xg = (jnp.dot(m_all, w_ih_ref[...], preferred_element_type=jnp.float32)
          + b_gates_ref[...])                                     # (T*B, 4H), lives in vregs

    w_hh = w_hh_ref[...]                                          # (H, 4H)
    h = h0_ref[...].astype(jnp.float32)
    c = c0_ref[...].astype(jnp.float32)

    # ---- serial LSTM recurrence (PyTorch gate order i, f, g, o), fully unrolled ----
    h_list = []
    for t in range(T):                                            # static unroll; T is small
        gates = xg[t * B:(t + 1) * B, :] + jnp.dot(
            h, w_hh, preferred_element_type=jnp.float32)          # (B, 4H) = one f32 vreg
        # Full-vreg transcendentals: one sigmoid + one tanh cover all four gates.
        sg = jax.nn.sigmoid(gates)
        th = jnp.tanh(gates)
        i_g = sg[:, 0 * H:1 * H]
        f_g = sg[:, 1 * H:2 * H]
        g_g = th[:, 2 * H:3 * H]
        o_g = sg[:, 3 * H:4 * H]
        c = f_g * c + i_g * g_g
        h = o_g * jnp.tanh(c)
        h_list.append(h)

    h_all = jnp.concatenate(h_list, axis=0)                       # (T*B, H), still in vregs

    # ---- batched, lane-dense output head: relu(fc_out(h_t)) for all steps ----
    bb = jnp.maximum(
        jnp.dot(h_all, w_out_ref[...], preferred_element_type=jnp.float32)
        + b_out_ref[...], 0.0)                                    # (T*B, K_pad)
    out_ref[...] = bb.astype(out_ref.dtype)


def decoder_forward(encoded_in, odometry_in, params):
    """encoded_in = (h0, c0): each (B, H).  odometry_in: (T, B, IN)."""
    h0, c0 = encoded_in
    T, B, IN = odometry_in.shape
    H = h0.shape[-1]
    M = params["w_mlp"].shape[-1]
    K = params["w_out"].shape[-1]
    KP = pl.cdiv(K, 128) * 128                                    # lane-dense output width

    odo_flat = odometry_in.reshape(T * B, IN)                     # layout plumbing only
    b_gates = params["b_ih"] + params["b_hh"]                     # fold the two LSTM biases
    # Zero-pad the output head to a lane multiple (unmasked stores in-kernel).
    w_out_pad = jnp.zeros((H, KP), jnp.float32).at[:, :K].set(params["w_out"])
    b_out_pad = jnp.zeros((1, KP), jnp.float32).at[:, :K].set(params["b_out"])

    full = lambda i: (0, 0)

    grid_spec = pltpu.PrefetchScalarGridSpec(
        num_scalar_prefetch=0,
        grid=(1,),                                                # single invocation
        in_specs=[
            pl.BlockSpec((T * B, IN), full),                      # odometry (all steps)
            pl.BlockSpec((B, H), full),                           # h0
            pl.BlockSpec((B, H), full),                           # c0
            pl.BlockSpec((IN, M), full),                          # w_mlp
            pl.BlockSpec((1, M), full),                           # b_mlp
            pl.BlockSpec((M, 4 * H), full),                       # w_ih
            pl.BlockSpec((H, 4 * H), full),                       # w_hh
            pl.BlockSpec((1, 4 * H), full),                       # b_ih + b_hh (folded)
            pl.BlockSpec((H, KP), full),                          # w_out (lane-padded)
            pl.BlockSpec((1, KP), full),                          # b_out (lane-padded)
        ],
        out_specs=pl.BlockSpec((T * B, KP), full),
    )

    out_flat = pl.pallas_call(
        decoder_kernel,
        out_shape=jax.ShapeDtypeStruct((T * B, KP), jnp.float32),
        grid_spec=grid_spec,
        compiler_params=pltpu.CompilerParams(
            dimension_semantics=("arbitrary",)),
    )(odo_flat, h0, c0,
      params["w_mlp"], params["b_mlp"],
      params["w_ih"], params["w_hh"], b_gates,
      w_out_pad, b_out_pad)

    return out_flat[:, :K].reshape(T, B, K)


# ------------------------- pure-JAX reference -------------------------
def decoder_reference(encoded_in, odometry_in, params):
    h0, c0 = encoded_in
    H = h0.shape[-1]

    def step(carry, x_t):
        h, c = carry
        m = jnp.maximum(x_t @ params["w_mlp"] + params["b_mlp"], 0.0)
        gates = (m @ params["w_ih"] + params["b_ih"]
                 + h @ params["w_hh"] + params["b_hh"])
        i = jax.nn.sigmoid(gates[:, 0 * H:1 * H])
        f = jax.nn.sigmoid(gates[:, 1 * H:2 * H])
        g = jnp.tanh(gates[:, 2 * H:3 * H])
        o = jax.nn.sigmoid(gates[:, 3 * H:4 * H])
        c_new = f * c + i * g
        h_new = o * jnp.tanh(c_new)
        bb = jnp.maximum(h_new @ params["w_out"] + params["b_out"], 0.0)
        return (h_new, c_new), bb

    _, out = jax.lax.scan(step, (h0, c0), odometry_in)
    return out


# ------------------------- driver -------------------------
def make_params(key, input_dim, mlp_size, hidden_dim, mlp_kernel):
    # NOTE: weights are (in_features, out_features) — pre-transposed vs PyTorch's
    # nn.Linear / LSTMCell (out, in) convention.
    ks = jax.random.split(key, 10)
    s = 0.1
    return {
        "w_mlp": s * jax.random.normal(ks[0], (input_dim, mlp_size), jnp.float32),
        "b_mlp": s * jax.random.normal(ks[1], (1, mlp_size), jnp.float32),
        "w_ih":  s * jax.random.normal(ks[2], (mlp_size, 4 * hidden_dim), jnp.float32),
        "b_ih":  s * jax.random.normal(ks[3], (1, 4 * hidden_dim), jnp.float32),
        "w_hh":  s * jax.random.normal(ks[4], (hidden_dim, 4 * hidden_dim), jnp.float32),
        "b_hh":  s * jax.random.normal(ks[5], (1, 4 * hidden_dim), jnp.float32),
        "w_out": s * jax.random.normal(ks[6], (hidden_dim, mlp_kernel), jnp.float32),
        "b_out": s * jax.random.normal(ks[7], (1, mlp_kernel), jnp.float32),
    }


if __name__ == "__main__":
    # seqLSTM_config = {input_dim: 16, hidden_dim: 32, mlp_size: 16}
    # prediction_len = 8, mlp_kernel_size = 4
    T, B, IN, H, M, K = 8, 8, 16, 32, 16, 4

    key = jax.random.PRNGKey(0)
    k_odo, k_h, k_c, k_p = jax.random.split(key, 4)
    odometry_in = jax.random.normal(k_odo, (T, B, IN), jnp.float32)
    h0 = jax.random.normal(k_h, (B, H), jnp.float32)
    c0 = jax.random.normal(k_c, (B, H), jnp.float32)
    params = make_params(k_p, IN, M, H, K)

    out = decoder_forward((h0, c0), odometry_in, params)
    out = jax.block_until_ready(out)

    ref = decoder_reference((h0, c0), odometry_in, params)
    assert out.shape == (T, B, K)
    assert jnp.allclose(out, ref, atol=1e-5, rtol=1e-5), "mismatch vs reference"

    print("KERNEL_OK")
</pallas_src>

<mosaic_0001>
module attributes {stable_mosaic.version = 11 : i64} {
  func.func @decoder_kernel(%arg0: i32, %arg1: memref<64x16xf32, #tpu.memory_space<vmem>>, %arg2: memref<8x32xf32, #tpu.memory_space<vmem>>, %arg3: memref<8x32xf32, #tpu.memory_space<vmem>>, %arg4: memref<16x16xf32, #tpu.memory_space<vmem>>, %arg5: memref<1x16xf32, #tpu.memory_space<vmem>>, %arg6: memref<16x128xf32, #tpu.memory_space<vmem>>, %arg7: memref<32x128xf32, #tpu.memory_space<vmem>>, %arg8: memref<1x128xf32, #tpu.memory_space<vmem>>, %arg9: memref<32x128xf32, #tpu.memory_space<vmem>>, %arg10: memref<1x128xf32, #tpu.memory_space<vmem>>, %arg11: memref<64x128xf32, #tpu.memory_space<vmem>>) attributes {dimension_semantics = [#tpu.dimension_semantics<arbitrary>], iteration_bounds = array<i64: 1>, scalar_prefetch = 0 : i64, scratch_operands = 0 : i64, tpu.core_type = #tpu.core_type<tc>, window_params = [{pipeline_mode = #tpu.pipeline_mode<synchronous>, transform_indices = @transform_0, window_bounds = array<i64: 64, 16>}, {pipeline_mode = #tpu.pipeline_mode<synchronous>, transform_indices = @transform_1, window_bounds = array<i64: 8, 32>}, {pipeline_mode = #tpu.pipeline_mode<synchronous>, transform_indices = @transform_2, window_bounds = array<i64: 8, 32>}, {pipeline_mode = #tpu.pipeline_mode<synchronous>, transform_indices = @transform_3, window_bounds = array<i64: 16, 16>}, {pipeline_mode = #tpu.pipeline_mode<synchronous>, transform_indices = @transform_4, window_bounds = array<i64: 1, 16>}, {pipeline_mode = #tpu.pipeline_mode<synchronous>, transform_indices = @transform_5, window_bounds = array<i64: 16, 128>}, {pipeline_mode = #tpu.pipeline_mode<synchronous>, transform_indices = @transform_6, window_bounds = array<i64: 32, 128>}, {pipeline_mode = #tpu.pipeline_mode<synchronous>, transform_indices = @transform_7, window_bounds = array<i64: 1, 128>}, {pipeline_mode = #tpu.pipeline_mode<synchronous>, transform_indices = @transform_8, window_bounds = array<i64: 32, 128>}, {pipeline_mode = #tpu.pipeline_mode<synchronous>, transform_indices = @transform_9, window_bounds = array<i64: 1, 128>}, {pipeline_mode = #tpu.pipeline_mode<synchronous>, transform_indices = @transform_10, window_bounds = array<i64: 64, 128>}]} {
    %c0 = arith.constant 0 : index
    %c0_0 = arith.constant 0 : index
    %0 = vector.load %arg1[%c0, %c0_0] : memref<64x16xf32, #tpu.memory_space<vmem>>, vector<64x16xf32>
    %c0_1 = arith.constant 0 : index
    %c0_2 = arith.constant 0 : index
    %1 = vector.load %arg4[%c0_1, %c0_2] : memref<16x16xf32, #tpu.memory_space<vmem>>, vector<16x16xf32>
    %cst = arith.constant dense<0.000000e+00> : vector<64x16xf32>
    %2 = tpu.matmul %0, %1, %cst {dimension_numbers = #tpu.dot_dimension_numbers<[1], [0], [0], [1], [0, 0, 1, 1], [], []>} : vector<64x16xf32>, vector<16x16xf32>, vector<64x16xf32> -> vector<64x16xf32>
    %c0_3 = arith.constant 0 : index
    %c0_4 = arith.constant 0 : index
    %3 = vector.load %arg5[%c0_3, %c0_4] : memref<1x16xf32, #tpu.memory_space<vmem>>, vector<1x16xf32>
    %4 = vector.broadcast %3 : vector<1x16xf32> to vector<64x16xf32>
    %5 = arith.addf %2, %4 : vector<64x16xf32>
    %cst_5 = arith.constant 0.000000e+00 : f32
    %6 = vector.broadcast %cst_5 : f32 to vector<64x16xf32>
    %7 = arith.maximumf %5, %6 : vector<64x16xf32>
    %c0_6 = arith.constant 0 : index
    %c0_7 = arith.constant 0 : index
    %8 = vector.load %arg6[%c0_6, %c0_7] : memref<16x128xf32, #tpu.memory_space<vmem>>, vector<16x128xf32>
    %cst_8 = arith.constant dense<0.000000e+00> : vector<64x128xf32>
    %9 = tpu.matmul %7, %8, %cst_8 {dimension_numbers = #tpu.dot_dimension_numbers<[1], [0], [0], [1], [0, 0, 1, 1], [], []>} : vector<64x16xf32>, vector<16x128xf32>, vector<64x128xf32> -> vector<64x128xf32>
    %c0_9 = arith.constant 0 : index
    %c0_10 = arith.constant 0 : index
    %10 = vector.load %arg8[%c0_9, %c0_10] : memref<1x128xf32, #tpu.memory_space<vmem>>, vector<1x128xf32>
    %11 = vector.broadcast %10 : vector<1x128xf32> to vector<64x128xf32>
    %12 = arith.addf %9, %11 : vector<64x128xf32>
    %c0_11 = arith.constant 0 : index
    %c0_12 = arith.constant 0 : index
    %13 = vector.load %arg7[%c0_11, %c0_12] : memref<32x128xf32, #tpu.memory_space<vmem>>, vector<32x128xf32>
    %c0_13 = arith.constant 0 : index
    %c0_14 = arith.constant 0 : index
    %14 = vector.load %arg2[%c0_13, %c0_14] : memref<8x32xf32, #tpu.memory_space<vmem>>, vector<8x32xf32>
    %c0_15 = arith.constant 0 : index
    %c0_16 = arith.constant 0 : index
    %15 = vector.load %arg3[%c0_15, %c0_16] : memref<8x32xf32, #tpu.memory_space<vmem>>, vector<8x32xf32>
    %16 = vector.extract_strided_slice %12 {offsets = [0, 0], sizes = [8, 128], strides = [1, 1]} : vector<64x128xf32> to vector<8x128xf32>
    %cst_17 = arith.constant dense<0.000000e+00> : vector<8x128xf32>
    %17 = tpu.matmul %14, %13, %cst_17 {dimension_numbers = #tpu.dot_dimension_numbers<[1], [0], [0], [1], [0, 0, 1, 1], [], []>} : vector<8x32xf32>, vector<32x128xf32>, vector<8x128xf32> -> vector<8x128xf32>
    %18 = arith.addf %16, %17 : vector<8x128xf32>
    %19 = arith.negf %18 : vector<8x128xf32>
    %20 = math.exp %19 : vector<8x128xf32>
    %cst_18 = arith.constant 1.000000e+00 : f32
    %21 = vector.broadcast %cst_18 : f32 to vector<8x128xf32>
    %22 = arith.addf %21, %20 : vector<8x128xf32>
    %23 = arith.divf %21, %22 : vector<8x128xf32>
    %24 = math.tanh %18 : vector<8x128xf32>
    %25 = vector.extract_strided_slice %23 {offsets = [0, 0], sizes = [8, 32], strides = [1, 1]} : vector<8x128xf32> to vector<8x32xf32>
    %26 = vector.extract_strided_slice %23 {offsets = [0, 32], sizes = [8, 32], strides = [1, 1]} : vector<8x128xf32> to vector<8x32xf32>
    %27 = vector.extract_strided_slice %24 {offsets = [0, 64], sizes = [8, 32], strides = [1, 1]} : vector<8x128xf32> to vector<8x32xf32>
    %28 = vector.extract_strided_slice %23 {offsets = [0, 96], sizes = [8, 32], strides = [1, 1]} : vector<8x128xf32> to vector<8x32xf32>
    %29 = arith.mulf %26, %15 : vector<8x32xf32>
    %30 = arith.mulf %25, %27 : vector<8x32xf32>
    %31 = arith.addf %29, %30 : vector<8x32xf32>
    %32 = math.tanh %31 : vector<8x32xf32>
    %33 = arith.mulf %28, %32 : vector<8x32xf32>
    %34 = vector.extract_strided_slice %12 {offsets = [8, 0], sizes = [8, 128], strides = [1, 1]} : vector<64x128xf32> to vector<8x128xf32>
    %cst_19 = arith.constant dense<0.000000e+00> : vector<8x128xf32>
    %35 = tpu.matmul %33, %13, %cst_19 {dimension_numbers = #tpu.dot_dimension_numbers<[1], [0], [0], [1], [0, 0, 1, 1], [], []>} : vector<8x32xf32>, vector<32x128xf32>, vector<8x128xf32> -> vector<8x128xf32>
    %36 = arith.addf %34, %35 : vector<8x128xf32>
    %37 = arith.negf %36 : vector<8x128xf32>
    %38 = math.exp %37 : vector<8x128xf32>
    %cst_20 = arith.constant 1.000000e+00 : f32
    %39 = vector.broadcast %cst_20 : f32 to vector<8x128xf32>
    %40 = arith.addf %39, %38 : vector<8x128xf32>
    %41 = arith.divf %39, %40 : vector<8x128xf32>
    %42 = math.tanh %36 : vector<8x128xf32>
    %43 = vector.extract_strided_slice %41 {offsets = [0, 0], sizes = [8, 32], strides = [1, 1]} : vector<8x128xf32> to vector<8x32xf32>
    %44 = vector.extract_strided_slice %41 {offsets = [0, 32], sizes = [8, 32], strides = [1, 1]} : vector<8x128xf32> to vector<8x32xf32>
    %45 = vector.extract_strided_slice %42 {offsets = [0, 64], sizes = [8, 32], strides = [1, 1]} : vector<8x128xf32> to vector<8x32xf32>
    %46 = vector.extract_strided_slice %41 {offsets = [0, 96], sizes = [8, 32], strides = [1, 1]} : vector<8x128xf32> to vector<8x32xf32>
    %47 = arith.mulf %44, %31 : vector<8x32xf32>
    %48 = arith.mulf %43, %45 : vector<8x32xf32>
    %49 = arith.addf %47, %48 : vector<8x32xf32>
    %50 = math.tanh %49 : vector<8x32xf32>
    %51 = arith.mulf %46, %50 : vector<8x32xf32>
    %52 = vector.extract_strided_slice %12 {offsets = [16, 0], sizes = [8, 128], strides = [1, 1]} : vector<64x128xf32> to vector<8x128xf32>
    %cst_21 = arith.constant dense<0.000000e+00> : vector<8x128xf32>
    %53 = tpu.matmul %51, %13, %cst_21 {dimension_numbers = #tpu.dot_dimension_numbers<[1], [0], [0], [1], [0, 0, 1, 1], [], []>} : vector<8x32xf32>, vector<32x128xf32>, vector<8x128xf32> -> vector<8x128xf32>
    %54 = arith.addf %52, %53 : vector<8x128xf32>
    %55 = arith.negf %54 : vector<8x128xf32>
    %56 = math.exp %55 : vector<8x128xf32>
    %cst_22 = arith.constant 1.000000e+00 : f32
    %57 = vector.broadcast %cst_22 : f32 to vector<8x128xf32>
    %58 = arith.addf %57, %56 : vector<8x128xf32>
    %59 = arith.divf %57, %58 : vector<8x128xf32>
    %60 = math.tanh %54 : vector<8x128xf32>
    %61 = vector.extract_strided_slice %59 {offsets = [0, 0], sizes = [8, 32], strides = [1, 1]} : vector<8x128xf32> to vector<8x32xf32>
    %62 = vector.extract_strided_slice %59 {offsets = [0, 32], sizes = [8, 32], strides = [1, 1]} : vector<8x128xf32> to vector<8x32xf32>
    %63 = vector.extract_strided_slice %60 {offsets = [0, 64], sizes = [8, 32], strides = [1, 1]} : vector<8x128xf32> to vector<8x32xf32>
    %64 = vector.extract_strided_slice %59 {offsets = [0, 96], sizes = [8, 32], strides = [1, 1]} : vector<8x128xf32> to vector<8x32xf32>
    %65 = arith.mulf %62, %49 : vector<8x32xf32>
    %66 = arith.mulf %61, %63 : vector<8x32xf32>
    %67 = arith.addf %65, %66 : vector<8x32xf32>
    %68 = math.tanh %67 : vector<8x32xf32>
    %69 = arith.mulf %64, %68 : vector<8x32xf32>
    %70 = vector.extract_strided_slice %12 {offsets = [24, 0], sizes = [8, 128], strides = [1, 1]} : vector<64x128xf32> to vector<8x128xf32>
    %cst_23 = arith.constant dense<0.000000e+00> : vector<8x128xf32>
    %71 = tpu.matmul %69, %13, %cst_23 {dimension_numbers = #tpu.dot_dimension_numbers<[1], [0], [0], [1], [0, 0, 1, 1], [], []>} : vector<8x32xf32>, vector<32x128xf32>, vector<8x128xf32> -> vector<8x128xf32>
    %72 = arith.addf %70, %71 : vector<8x128xf32>
    %73 = arith.negf %72 : vector<8x128xf32>
    %74 = math.exp %73 : vector<8x128xf32>
    %cst_24 = arith.constant 1.000000e+00 : f32
    %75 = vector.broadcast %cst_24 : f32 to vector<8x128xf32>
    %76 = arith.addf %75, %74 : vector<8x128xf32>
    %77 = arith.divf %75, %76 : vector<8x128xf32>
    %78 = math.tanh %72 : vector<8x128xf32>
    %79 = vector.extract_strided_slice %77 {offsets = [0, 0], sizes = [8, 32], strides = [1, 1]} : vector<8x128xf32> to vector<8x32xf32>
    %80 = vector.extract_strided_slice %77 {offsets = [0, 32], sizes = [8, 32], strides = [1, 1]} : vector<8x128xf32> to vector<8x32xf32>
    %81 = vector.extract_strided_slice %78 {offsets = [0, 64], sizes = [8, 32], strides = [1, 1]} : vector<8x128xf32> to vector<8x32xf32>
    %82 = vector.extract_strided_slice %77 {offsets = [0, 96], sizes = [8, 32], strides = [1, 1]} : vector<8x128xf32> to vector<8x32xf32>
    %83 = arith.mulf %80, %67 : vector<8x32xf32>
    %84 = arith.mulf %79, %81 : vector<8x32xf32>
    %85 = arith.addf %83, %84 : vector<8x32xf32>
    %86 = math.tanh %85 : vector<8x32xf32>
    %87 = arith.mulf %82, %86 : vector<8x32xf32>
    %88 = vector.extract_strided_slice %12 {offsets = [32, 0], sizes = [8, 128], strides = [1, 1]} : vector<64x128xf32> to vector<8x128xf32>
    %cst_25 = arith.constant dense<0.000000e+00> : vector<8x128xf32>
    %89 = tpu.matmul %87, %13, %cst_25 {dimension_numbers = #tpu.dot_dimension_numbers<[1], [0], [0], [1], [0, 0, 1, 1], [], []>} : vector<8x32xf32>, vector<32x128xf32>, vector<8x128xf32> -> vector<8x128xf32>
    %90 = arith.addf %88, %89 : vector<8x128xf32>
    %91 = arith.negf %90 : vector<8x128xf32>
    %92 = math.exp %91 : vector<8x128xf32>
    %cst_26 = arith.constant 1.000000e+00 : f32
    %93 = vector.broadcast %cst_26 : f32 to vector<8x128xf32>
    %94 = arith.addf %93, %92 : vector<8x128xf32>
    %95 = arith.divf %93, %94 : vector<8x128xf32>
    %96 = math.tanh %90 : vector<8x128xf32>
    %97 = vector.extract_strided_slice %95 {offsets = [0, 0], sizes = [8, 32], strides = [1, 1]} : vector<8x128xf32> to vector<8x32xf32>
    %98 = vector.extract_strided_slice %95 {offsets = [0, 32], sizes = [8, 32], strides = [1, 1]} : vector<8x128xf32> to vector<8x32xf32>
    %99 = vector.extract_strided_slice %96 {offsets = [0, 64], sizes = [8, 32], strides = [1, 1]} : vector<8x128xf32> to vector<8x32xf32>
    %100 = vector.extract_strided_slice %95 {offsets = [0, 96], sizes = [8, 32], strides = [1, 1]} : vector<8x128xf32> to vector<8x32xf32>
    %101 = arith.mulf %98, %85 : vector<8x32xf32>
    %102 = arith.mulf %97, %99 : vector<8x32xf32>
    %103 = arith.addf %101, %102 : vector<8x32xf32>
    %104 = math.tanh %103 : vector<8x32xf32>
    %105 = arith.mulf %100, %104 : vector<8x32xf32>
    %106 = vector.extract_strided_slice %12 {offsets = [40, 0], sizes = [8, 128], strides = [1, 1]} : vector<64x128xf32> to vector<8x128xf32>
    %cst_27 = arith.constant dense<0.000000e+00> : vector<8x128xf32>
    %107 = tpu.matmul %105, %13, %cst_27 {dimension_numbers = #tpu.dot_dimension_numbers<[1], [0], [0], [1], [0, 0, 1, 1], [], []>} : vector<8x32xf32>, vector<32x128xf32>, vector<8x128xf32> -> vector<8x128xf32>
    %108 = arith.addf %106, %107 : vector<8x128xf32>
    %109 = arith.negf %108 : vector<8x128xf32>
    %110 = math.exp %109 : vector<8x128xf32>
    %cst_28 = arith.constant 1.000000e+00 : f32
    %111 = vector.broadcast %cst_28 : f32 to vector<8x128xf32>
    %112 = arith.addf %111, %110 : vector<8x128xf32>
    %113 = arith.divf %111, %112 : vector<8x128xf32>
    %114 = math.tanh %108 : vector<8x128xf32>
    %115 = vector.extract_strided_slice %113 {offsets = [0, 0], sizes = [8, 32], strides = [1, 1]} : vector<8x128xf32> to vector<8x32xf32>
    %116 = vector.extract_strided_slice %113 {offsets = [0, 32], sizes = [8, 32], strides = [1, 1]} : vector<8x128xf32> to vector<8x32xf32>
    %117 = vector.extract_strided_slice %114 {offsets = [0, 64], sizes = [8, 32], strides = [1, 1]} : vector<8x128xf32> to vector<8x32xf32>
    %118 = vector.extract_strided_slice %113 {offsets = [0, 96], sizes = [8, 32], strides = [1, 1]} : vector<8x128xf32> to vector<8x32xf32>
    %119 = arith.mulf %116, %103 : vector<8x32xf32>
    %120 = arith.mulf %115, %117 : vector<8x32xf32>
    %121 = arith.addf %119, %120 : vector<8x32xf32>
    %122 = math.tanh %121 : vector<8x32xf32>
    %123 = arith.mulf %118, %122 : vector<8x32xf32>
    %124 = vector.extract_strided_slice %12 {offsets = [48, 0], sizes = [8, 128], strides = [1, 1]} : vector<64x128xf32> to vector<8x128xf32>
    %cst_29 = arith.constant dense<0.000000e+00> : vector<8x128xf32>
    %125 = tpu.matmul %123, %13, %cst_29 {dimension_numbers = #tpu.dot_dimension_numbers<[1], [0], [0], [1], [0, 0, 1, 1], [], []>} : vector<8x32xf32>, vector<32x128xf32>, vector<8x128xf32> -> vector<8x128xf32>
    %126 = arith.addf %124, %125 : vector<8x128xf32>
    %127 = arith.negf %126 : vector<8x128xf32>
    %128 = math.exp %127 : vector<8x128xf32>
    %cst_30 = arith.constant 1.000000e+00 : f32
    %129 = vector.broadcast %cst_30 : f32 to vector<8x128xf32>
    %130 = arith.addf %129, %128 : vector<8x128xf32>
    %131 = arith.divf %129, %130 : vector<8x128xf32>
    %132 = math.tanh %126 : vector<8x128xf32>
    %133 = vector.extract_strided_slice %131 {offsets = [0, 0], sizes = [8, 32], strides = [1, 1]} : vector<8x128xf32> to vector<8x32xf32>
    %134 = vector.extract_strided_slice %131 {offsets = [0, 32], sizes = [8, 32], strides = [1, 1]} : vector<8x128xf32> to vector<8x32xf32>
    %135 = vector.extract_strided_slice %132 {offsets = [0, 64], sizes = [8, 32], strides = [1, 1]} : vector<8x128xf32> to vector<8x32xf32>
    %136 = vector.extract_strided_slice %131 {offsets = [0, 96], sizes = [8, 32], strides = [1, 1]} : vector<8x128xf32> to vector<8x32xf32>
    %137 = arith.mulf %134, %121 : vector<8x32xf32>
    %138 = arith.mulf %133, %135 : vector<8x32xf32>
    %139 = arith.addf %137, %138 : vector<8x32xf32>
    %140 = math.tanh %139 : vector<8x32xf32>
    %141 = arith.mulf %136, %140 : vector<8x32xf32>
    %142 = vector.extract_strided_slice %12 {offsets = [56, 0], sizes = [8, 128], strides = [1, 1]} : vector<64x128xf32> to vector<8x128xf32>
    %cst_31 = arith.constant dense<0.000000e+00> : vector<8x128xf32>
    %143 = tpu.matmul %141, %13, %cst_31 {dimension_numbers = #tpu.dot_dimension_numbers<[1], [0], [0], [1], [0, 0, 1, 1], [], []>} : vector<8x32xf32>, vector<32x128xf32>, vector<8x128xf32> -> vector<8x128xf32>
    %144 = arith.addf %142, %143 : vector<8x128xf32>
    %145 = arith.negf %144 : vector<8x128xf32>
    %146 = math.exp %145 : vector<8x128xf32>
    %cst_32 = arith.constant 1.000000e+00 : f32
    %147 = vector.broadcast %cst_32 : f32 to vector<8x128xf32>
    %148 = arith.addf %147, %146 : vector<8x128xf32>
    %149 = arith.divf %147, %148 : vector<8x128xf32>
    %150 = math.tanh %144 : vector<8x128xf32>
    %151 = vector.extract_strided_slice %149 {offsets = [0, 0], sizes = [8, 32], strides = [1, 1]} : vector<8x128xf32> to vector<8x32xf32>
    %152 = vector.extract_strided_slice %149 {offsets = [0, 32], sizes = [8, 32], strides = [1, 1]} : vector<8x128xf32> to vector<8x32xf32>
    %153 = vector.extract_strided_slice %150 {offsets = [0, 64], sizes = [8, 32], strides = [1, 1]} : vector<8x128xf32> to vector<8x32xf32>
    %154 = vector.extract_strided_slice %149 {offsets = [0, 96], sizes = [8, 32], strides = [1, 1]} : vector<8x128xf32> to vector<8x32xf32>
    %155 = arith.mulf %152, %139 : vector<8x32xf32>
    %156 = arith.mulf %151, %153 : vector<8x32xf32>
    %157 = arith.addf %155, %156 : vector<8x32xf32>
    %158 = math.tanh %157 : vector<8x32xf32>
    %159 = arith.mulf %154, %158 : vector<8x32xf32>
    %160 = tpu.concatenate %33, %51, %69, %87, %105, %123, %141, %159 in 0 : vector<8x32xf32>, vector<8x32xf32>, vector<8x32xf32>, vector<8x32xf32>, vector<8x32xf32>, vector<8x32xf32>, vector<8x32xf32>, vector<8x32xf32> -> vector<64x32xf32>
    %c0_33 = arith.constant 0 : index
    %c0_34 = arith.constant 0 : index
    %161 = vector.load %arg9[%c0_33, %c0_34] : memref<32x128xf32, #tpu.memory_space<vmem>>, vector<32x128xf32>
    %cst_35 = arith.constant dense<0.000000e+00> : vector<64x128xf32>
    %162 = tpu.matmul %160, %161, %cst_35 {dimension_numbers = #tpu.dot_dimension_numbers<[1], [0], [0], [1], [0, 0, 1, 1], [], []>} : vector<64x32xf32>, vector<32x128xf32>, vector<64x128xf32> -> vector<64x128xf32>
    %c0_36 = arith.constant 0 : index
    %c0_37 = arith.constant 0 : index
    %163 = vector.load %arg10[%c0_36, %c0_37] : memref<1x128xf32, #tpu.memory_space<vmem>>, vector<1x128xf32>
    %164 = vector.broadcast %163 : vector<1x128xf32> to vector<64x128xf32>
    %165 = arith.addf %162, %164 : vector<64x128xf32>
    %cst_38 = arith.constant 0.000000e+00 : f32
    %166 = vector.broadcast %cst_38 : f32 to vector<64x128xf32>
    %167 = arith.maximumf %165, %166 : vector<64x128xf32>
    %c0_39 = arith.constant 0 : index
    %c0_40 = arith.constant 0 : index
    %168 = vector.load %arg11[%c0_39, %c0_40] : memref<64x128xf32, #tpu.memory_space<vmem>>, vector<64x128xf32>
    tpu.vector_store %arg11[%c0_39, %c0_40], %167 {strides = array<i32>} : memref<64x128xf32, #tpu.memory_space<vmem>>, vector<64x128xf32>,
    return
  }
  func.func @transform_0(%arg0: i32) -> (i32, i32) {
    %c0_i32 = arith.constant 0 : i32
    %c0_i32_0 = arith.constant 0 : i32
    %c0_i32_1 = arith.constant 0 : i32
    return %c0_i32, %c0_i32_0 : i32, i32
  }
  func.func @transform_1(%arg0: i32) -> (i32, i32) {
    %c0_i32 = arith.constant 0 : i32
    %c0_i32_0 = arith.constant 0 : i32
    %c0_i32_1 = arith.constant 0 : i32
    return %c0_i32, %c0_i32_0 : i32, i32
  }
  func.func @transform_2(%arg0: i32) -> (i32, i32) {
    %c0_i32 = arith.constant 0 : i32
    %c0_i32_0 = arith.constant 0 : i32
    %c0_i32_1 = arith.constant 0 : i32
    return %c0_i32, %c0_i32_0 : i32, i32
  }
  func.func @transform_3(%arg0: i32) -> (i32, i32) {
    %c0_i32 = arith.constant 0 : i32
    %c0_i32_0 = arith.constant 0 : i32
    %c0_i32_1 = arith.constant 0 : i32
    return %c0_i32, %c0_i32_0 : i32, i32
  }
  func.func @transform_4(%arg0: i32) -> (i32, i32) {
    %c0_i32 = arith.constant 0 : i32
    %c0_i32_0 = arith.constant 0 : i32
    %c0_i32_1 = arith.constant 0 : i32
    return %c0_i32, %c0_i32_0 : i32, i32
  }
  func.func @transform_5(%arg0: i32) -> (i32, i32) {
    %c0_i32 = arith.constant 0 : i32
    %c0_i32_0 = arith.constant 0 : i32
    %c0_i32_1 = arith.constant 0 : i32
    return %c0_i32, %c0_i32_0 : i32, i32
  }
  func.func @transform_6(%arg0: i32) -> (i32, i32) {
    %c0_i32 = arith.constant 0 : i32
    %c0_i32_0 = arith.constant 0 : i32
    %c0_i32_1 = arith.constant 0 : i32
    return %c0_i32, %c0_i32_0 : i32, i32
  }
  func.func @transform_7(%arg0: i32) -> (i32, i32) {
    %c0_i32 = arith.constant 0 : i32
    %c0_i32_0 = arith.constant 0 : i32
    %c0_i32_1 = arith.constant 0 : i32
    return %c0_i32, %c0_i32_0 : i32, i32
  }
  func.func @transform_8(%arg0: i32) -> (i32, i32) {
    %c0_i32 = arith.constant 0 : i32
    %c0_i32_0 = arith.constant 0 : i32
    %c0_i32_1 = arith.constant 0 : i32
    return %c0_i32, %c0_i32_0 : i32, i32
  }
  func.func @transform_9(%arg0: i32) -> (i32, i32) {
    %c0_i32 = arith.constant 0 : i32
    %c0_i32_0 = arith.constant 0 : i32
    %c0_i32_1 = arith.constant 0 : i32
    return %c0_i32, %c0_i32_0 : i32, i32
  }
  func.func @transform_10(%arg0: i32) -> (i32, i32) {
    %c0_i32 = arith.constant 0 : i32
    %c0_i32_0 = arith.constant 0 : i32
    %c0_i32_1 = arith.constant 0 : i32
    return %c0_i32, %c0_i32_0 : i32, i32
  }
}

</mosaic_0001>

<bundles_post_ra>
// kernel: tpu_custom_call.1
= control target key start
LH: loop header
LB: loop body
LE: loop exit
PB: predicated region body
PF: predicated region fallthrough
CT: control target
= control target key end

     0   :  { %15 = vsyncpa [#allocation3], 0  ;;  %s2129_s0 = inlined_call_operand.vmem [shape: f32[64,16], index: 0, kind: input, shape index: {}]   ;;  %s2130_s1 = inlined_call_operand.hbm [shape: f32[8,32], index: 1, kind: input, shape index: {}]   ;;  %s2131_s2 = inlined_call_operand.hbm [shape: f32[8,32], index: 2, kind: input, shape index: {}]   ;;  %s2132_s3 = inlined_call_operand.vmem [shape: f32[16,16], index: 3, kind: input, shape index: {}]   ;;  %s2133_s4 = inlined_call_operand.vmem [shape: f32[1,16], index: 4, kind: input, shape index: {}]   ;;  %s2134_s5 = inlined_call_operand.vmem [shape: f32[16,128], index: 5, kind: input, shape index: {}]   ;;  %s2135_s6 = inlined_call_operand.vmem [shape: f32[32,128], index: 6, kind: input, shape index: {}]   ;;  %s2136_s7 = inlined_call_operand.vmem [shape: f32[1,128], index: 7, kind: input, shape index: {}]   ;;  %s2137_s8 = inlined_call_operand.vmem [shape: f32[32,128], index: 8, kind: input, shape index: {}]   ;;  %s2138_s9 = inlined_call_operand.vmem [shape: f32[1,128], index: 9, kind: input, shape index: {}]   ;;  %s2139_s10 = inlined_call_operand.hbm [shape: f32[64,128], index: 10, kind: output, shape index: {}]  }
   0x1   :  { %16 = vsyncpa [#allocation6], 0 }
   0x2   :  { %17 = vsyncpa [#allocation4], 0  ;;  %s1784_s13 = smov [#allocation2]   ;;  %s1785_s15 = smov [#allocation5]  }
   0x3   :  { %s26_s14 = sshll.u32 %s1784_s13, 4  ;;  %s36_s16 = sshll.u32 %s1785_s15, 4  ;;  %s27_s14 = int_to_ptr.vmem [resolvable:$true] %s26_s14  ;;  %s37_s16 = int_to_ptr.vmem [resolvable:$true] %s36_s16 }
   0x4   :  { %s1712_s19 = scalar_lea.hbm %s2130_s1, 128 }
   0x5   :  { %p1713_p0 = scmp.ne.s32.totalorder %s2130_s1, %s1712_s19  ;;  %p1716_p1 = scmp.lt.u32.totalorder %s1712_s19, %s2130_s1 }
   0x7   :  { %p1718_p2 = pnand %p1716_p1, %p1713_p0 }
   0x9   :  { %1721 = shalt.err (!%p1718_p2)
}
   0xa   :  { %s1722_s24 = scalar_lea.vmem %s27_s14, 128  ;;  %p1727_p4 = scmp.lt.s32.totalorder %s27_s14, %s27_s14 }
   0xb   :  { %p1723_p3 = scmp.ne.s32.totalorder %s27_s14, %s1722_s24  ;;  %p1728_p5 = scmp.lt.s32.totalorder %s1722_s24, %s1722_s24 }
   0xd   :  { %p1729_p6 = por %p1728_p5, %p1727_p4 }
   0xf   :  { %p1730_p7 = pnand %p1729_p6, %p1723_p3 }
  0x11   :  { %1733 = shalt.err (!%p1730_p7)
}
  0x12   :  { %29 = dma.hbm_to_vmem [thread:$0]  %s2130_s1, 128, %s27_s14, [#allocation3]  }
  0x13   :  { %s1734_s29 = scalar_lea.hbm %s2131_s2, 128 }
  0x14   :  { %p1735_p8 = scmp.ne.s32.totalorder %s2131_s2, %s1734_s29  ;;  %p1738_p9 = scmp.lt.u32.totalorder %s1734_s29, %s2131_s2 }
  0x16   :  { %p1740_p10 = pnand %p1738_p9, %p1735_p8 }
  0x18   :  { %1743 = shalt.err (!%p1740_p10)
}
  0x19   :  { %s1744_s15 = scalar_lea.vmem %s37_s16, 128  ;;  %p1749_p12 = scmp.lt.s32.totalorder %s37_s16, %s37_s16 }
  0x1a   :  { %p1745_p11 = scmp.ne.s32.totalorder %s37_s16, %s1744_s15  ;;  %p1750_p13 = scmp.lt.s32.totalorder %s1744_s15, %s1744_s15 }
  0x1c   :  { %p1751_p0 = por %p1750_p13, %p1749_p12 }
  0x1e   :  { %p1752_p1 = pnand %p1751_p0, %p1745_p11 }
  0x20   :  { %1755 = shalt.err (!%p1752_p1)
}
  0x21   :  { %39 = dma.hbm_to_vmem [thread:$0]  %s2131_s2, 128, %s37_s16, [#allocation6]  }
  0x22   :  { %1778 = dma.done.wait [#allocation3], 128  }
  0x23   :  { %1779 = vsyncadd [#allocation3], 4294967168 }
  0x24   :  { %1780 = dma.done.wait [#allocation6], 128  }
  0x25   :  { %1781 = vsyncadd [#allocation6], 4294967168  ;;  %vm77_vm0 = vcmask 130048   ;;  %v68_v0 = vld [vmem:[%s2132_s3] sm:$0xff]  ;;  %v69_v1 = vld [vmem:[%s2132_s3 + $0x8] sm:$0xff]  ;;  %v1786_v17 = vmov 0.0|0.0  }
  0x26   :  { %v60_v2 = vld [vmem:[%s2129_s0] sm:$0xff]  ;;  %v1572_v3 = vpack.c.bf16 %v69_v1, %v68_v0  ;;  %v216_v6 = vld [vmem:[%s2134_s5 + $0x8] sm:$0xff]  ;;  %v62_v10 = vld [vmem:[%s2129_s0 + $0x10] sm:$0xff]  ;;  %vm359_vm1 = vcmask 261120   ;;  %vm1787_vm2 = vmmov 0   ;;  %v1788_v22 = vmov 0.0  }
  0x27   :  { %1436 = vmatprep.mubr.msk.f32.mxu0 %vm77_vm0, %v60_v2  ;;  %v64_v4 = vld [vmem:[%s2129_s0 + $0x20] sm:$0xff]  ;;  %v61_v7 = vld [vmem:[%s2129_s0 + $0x8] sm:$0xff]  ;;  %v66_v11 = vld [vmem:[%s2129_s0 + $0x30] sm:$0xff]  ;;  %s1789_s24 = smov 64  }
  0x28   :  { %v215_v5 = vld [vmem:[%s2134_s5] sm:$0xff]  ;;  %1573 = vmatprep.subr.bf16.mxu0 %v1572_v3  ;;  %1636 = vmatprep.subr.bf16.mxu1 %v1572_v3  ;;  %v65_v8 = vld [vmem:[%s2129_s0 + $0x28] sm:$0xff]  ;;  %v63_v12 = vld [vmem:[%s2129_s0 + $0x18] sm:$0xff] }
  0x29   :  { %1575 = vmatpush3.bf16.msra.mxu0 %v1572_v3  ;;  %1637 = vmatpush3.bf16.msra.mxu1 %v1572_v3  ;;  %v1576_v9 = vpack.c.bf16 %v216_v6, %v215_v5  ;;  %v67_v13 = vld [vmem:[%s2129_s0 + $0x38] sm:$0xff]  ;;  %v353_v14 = vld [vmem:[%s2135_s6] sm:$0xff]  ;;  %v354_v15 = vld [vmem:[%s2135_s6 + $0x8] sm:$0xff] }
  0x2a   :  { %1442 = vmatprep.mubr.msk.f32.mxu1 %vm77_vm0, %v64_v4  ;;  %v1923_v16 = vpack.c.bf16 %v354_v15, %v353_v14  ;;  %1580 = vmatprep.subr.bf16.mxu0 %v1786_v17  ;;  %v355_v18 = vld [vmem:[%s2135_s6 + $0x10] sm:$0xff]  ;;  %v356_v19 = vld [vmem:[%s2135_s6 + $0x18] sm:$0xff]  ;;  %v357_v21 = vld [vmem:[#allocation2] sm:$0xff] }
  0x2b   :  { %1577 = vmatprep.subr.bf16.mxu1 %v1576_v9  ;;  %v1935_v20 = vpack.c.bf16 %v356_v19, %v355_v18  ;;  %v1317_v23 = vld [vmem:[%s2133_s4] ss:$0 sm:$0xff]  ;;  %v358_v60 = vld [vmem:[#allocation5] sm:$0xff] }
  0x2c   :  { %1437 = vmatmul.mubr.msk.f32.vlgmr.msra.gmra.mrb[0].mxu0 %vm77_vm0, %v61_v7  ;;  %1443 = vmatmul.mubr.msk.f32.vlgmr.msra.gmra.mrb[0].mxu1 %vm77_vm0, %v65_v8  ;;  %v1968_v50 = vld [vmem:[%s2136_s7] ss:$0 sm:$0xff]  ;;  %s1790_s7 = smov 32  }
  0x2d   :  { %1439 = vmatprep.mubr.msk.f32.mxu0 %vm77_vm0, %v62_v10  ;;  %1445 = vmatprep.mubr.msk.f32.mxu1 %vm77_vm0, %v66_v11 }
  0x2e   :  { %1579 = vmatpush3.bf16.msra.mxu1 %v1576_v9  ;;  %1582 = vmatpush3.bf16.msra.mxu0 %v1923_v16 }
  0x2f   :  { %1586 = vmatprep.subr.bf16.mxu1 %v1786_v17  ;;  %1583 = vmatprep.subr.bf16.mxu0 %v1786_v17 }
  0x30   :  { %1440 = vmatmul.mubr.msk.f32.gmra.mrb[2].mxu0 %vm77_vm0, %v63_v12  ;;  %1446 = vmatmul.mubr.msk.f32.gmra.mrb[2].mxu1 %vm77_vm0, %v67_v13 }
  0x31   :  { %1472 = vmatprep.mubr.msk.f32.mxu0 %vm1787_vm2, %v1788_v22 }
  0x32   :  { %1585 = vmatpush3.bf16.msra.mxu0 %v1935_v20 }
  0x33   :  { %1592 = vmatprep.subr.bf16.mxu0 %v1786_v17 }
  0x35   :  { %1473 = vmatmul.mubr.msk.f32.vlgmr.msra.gmra.mrb[4].mxu0 %vm359_vm1, %v357_v21 }
  0x36   :  { %1594 = vmatpush3.bf16.msra.mxu0 %v1923_v16  ;;  %1494 = vmatprep.mubr.msk.f32.mxu0 %vm1787_vm2, %v1788_v22 }
  0x37   :  { %1595 = vmatprep.subr.bf16.mxu0 %v1786_v17 }
  0x3a   :  { %1597 = vmatpush3.bf16.msra.mxu0 %v1935_v20 }
  0x3b   :  { %1604 = vmatprep.subr.bf16.mxu0 %v1786_v17 }
  0xff   :  { %v1438_v24 = vpop.f32.mrb[0].mxu0  ;;  %v1444_v25 = vpop.f32.mrb[0].mxu1 }
 0x100   :  { %v174_v26 = vadd.f32 %v1438_v24, %v1317_v23  ;;  %v168_v27 = vpop.f32.mrb[1].mxu0  ;;  %v188_v28 = vpop.f32.mrb[1].mxu1  ;;  %v194_v38 = vadd.f32 %v1444_v25, %v1317_v23 }
 0x101   :  { %v169_v29 = vadd.f32 %v1317_v23, %v168_v27  ;;  %v189_v32 = vadd.f32 %v1317_v23, %v188_v28 }
 0x102   :  { %v208_v33 = vmax.f32 %v174_v26, 0.0  ;;  %v212_v41 = vmax.f32 %v194_v38, 0.0 }
 0x103   :  { %v207_v30 = vmax.f32 %v169_v29, 0.0  ;;  %v1441_v31 = vpop.f32.mrb[2].mxu0  ;;  %v211_v40 = vmax.f32 %v189_v32, 0.0  ;;  %v1447_v42 = vpop.f32.mrb[2].mxu1 }
 0x104   :  { %v184_v34 = vadd.f32 %v1441_v31, %v1317_v23  ;;  %v178_v35 = vpop.f32.mrb[3].mxu0  ;;  %v204_v43 = vadd.f32 %v1447_v42, %v1317_v23  ;;  %v198_v44 = vpop.f32.mrb[3].mxu1 }
 0x105   :  { %1452 = vmatprep.mubr.msk.f32.mxu1 %vm77_vm0, %v207_v30  ;;  %v179_v36 = vadd.f32 %v1317_v23, %v178_v35  ;;  %v199_v45 = vadd.f32 %v1317_v23, %v198_v44 }
 0x106   :  { %1453 = vmatmul.mubr.msk.f32.vlgmr.msra.gmra.mrb[4].mxu1 %vm77_vm0, %v208_v33  ;;  %v210_v37 = vmax.f32 %v184_v34, 0.0  ;;  %v214_v46 = vmax.f32 %v204_v43, 0.0 }
 0x107   :  { %v209_v39 = vmax.f32 %v179_v36, 0.0  ;;  %1588 = vmatpush3.bf16.msra.mxu1 %v1923_v16  ;;  %v213_v47 = vmax.f32 %v199_v45, 0.0 }
 0x108   :  { %1589 = vmatprep.subr.bf16.mxu1 %v1786_v17  ;;  %v429_v48 = vpop.f32.mrb[4].mxu0 }
 0x109   :  { %1455 = vmatprep.mubr.msk.f32.mxu1 %vm77_vm0, %v209_v39  ;;  %v1474_v49 = vpop.f32.mrb[5].mxu0 }
 0x10a   :  { %1456 = vmatmul.mubr.msk.f32.gmra.mrb[6].mxu1 %vm77_vm0, %v210_v37 }
 0x10b   :  { %1458 = vmatprep.mubr.msk.f32.mxu1 %vm77_vm0, %v211_v40  ;;  %1591 = vmatpush3.bf16.msra.mxu1 %v1935_v20 }
 0x10c   :  { %1598 = vmatprep.subr.bf16.mxu1 %v1786_v17 }
 0x10e   :  { %1459 = vmatmul.mubr.msk.f32.gmra.mrb[8].mxu1 %vm77_vm0, %v212_v41 }
 0x10f   :  { %1461 = vmatprep.mubr.msk.f32.mxu1 %vm77_vm0, %v213_v47 }
 0x112   :  { %1462 = vmatmul.mubr.msk.f32.gmra.mrb[10].mxu1 %vm77_vm0, %v214_v46 }
 0x113   :  { %1483 = vmatprep.mubr.msk.f32.mxu1 %vm1787_vm2, %v1788_v22 }
 0x1d9   :  { %v1454_v51 = vpop.f32.mrb[4].mxu1 }
 0x1da   :  { %v314_v52 = vpop.f32.mrb[5].mxu1  ;;  %v320_v13 = vadd.f32 %v1454_v51, %v1968_v50 }
 0x1db   :  { %v315_v53 = vadd.f32 %v1968_v50, %v314_v52 }
 0x1dd   :  { %v433_v54 = vadd.f32 %v429_v48, %v315_v53  ;;  %v1971_v55 = vpop.f32.mrb[6].mxu1 }
 0x1de   :  { %v1973_v56 = vpop.f32.mrb[7].mxu1 }
 0x1df   :  { %1648 = vtanh.f32 %v433_v54  ;;  %v1336_v63 = vmul.f32 -1.442695, %v433_v54  ;;  %v325_v35 = vadd.f32 %v1968_v50, %v1973_v56  ;;  %v330_v54 = vadd.f32 %v1971_v55, %v1968_v50 }
 0x1e1   :  { %v1975_v57 = vpop.f32.mrb[8].mxu1  ;;  %1650 = vpow2.f32 %v1336_v63 }
 0x1e2   :  { %v1977_v58 = vpop.f32.mrb[9].mxu1 }
 0x1e5   :  { %v1981_v61 = vpop.f32.mrb[10].mxu1 }
 0x1e6   :  { %v1983_v62 = vpop.f32.mrb[11].mxu1 }
 0x1e9   :  { %v1649_v59 = vpop.eup %1648 }
 0x1ea   :  { %447 = vrot.lane.b32.xlu0 %v1649_v59, %s1789_s24 }
 0x1eb   :  { %v1651_v0 = vpop.eup %1650 }
 0x1ec   :  { %v437_v1 = vadd.f32 1.0, %v1651_v0 }
 0x1ee   :  { %442 = vrot.lane.b32.xlu0 %v358_v60, %s1790_s7  ;;  %1652 = vrcp.f32 %v437_v1 }
 0x1f8   :  { %v1653_v2 = vpop.eup %1652 }
 0x25c   :  { %v448_v3 = vpop.permute.xlu0 %447 }
 0x25d   :  { %v450_v4 = vmul.f32 %v1653_v2, %v448_v3 }
 0x25f   :  { %452 = vrot.lane.b32.xlu1 %v450_v4, %s1790_s7 }
 0x260   :  { %v443_v5 = vpop.permute.xlu0 %442 }
 0x261   :  { %v445_v6 = vmul.f32 %v1653_v2, %v443_v5 }
 0x2d1   :  { %v453_v7 = vpop.permute.xlu1 %452 }
 0x2d2   :  { %v455_v8 = vadd.f32 %v453_v7, %v445_v6 }
 0x2d4   :  { %1654 = vtanh.f32 %v455_v8 }
 0x2de   :  { %v1655_v9 = vpop.eup %1654 }
 0x2df   :  { %458 = vrot.lane.b32.xlu1 %v1655_v9, %s1789_s24 }
 0x351   :  { %v459_v10 = vpop.permute.xlu1 %458 }
 0x352   :  { %v461_v11 = vmul.f32 %v1653_v2, %v459_v10 }
 0x354   :  { %463 = vrot.lane.b32.xlu0 %v461_v11, %s1790_s7 }
 0x3c6   :  { %v1988_v12 = vpop.permute.xlu0 %463 }
 0x3c7   :  { %1484 = vmatmul.mubr.msk.f32.vlgmr.msra.gmra.mrb[12].mxu1 %vm359_vm1, %v1988_v12 }
 0x3c8   :  { %1600 = vmatpush3.bf16.msra.mxu1 %v1923_v16  ;;  %1505 = vmatprep.mubr.msk.f32.mxu1 %vm1787_vm2, %v1788_v22 }
 0x3c9   :  { %1601 = vmatprep.subr.bf16.mxu1 %v1786_v17 }
 0x3cc   :  { %1603 = vmatpush3.bf16.msra.mxu1 %v1935_v20 }
 0x3cd   :  { %1610 = vmatprep.subr.bf16.mxu1 %v1786_v17 }
 0x49a   :  { %v533_v14 = vpop.f32.mrb[12].mxu1 }
 0x49b   :  { %v537_v15 = vadd.f32 %v533_v14, %v320_v13  ;;  %v1485_v18 = vpop.f32.mrb[13].mxu1  ;;  %v335_v13 = vadd.f32 %v1968_v50, %v1977_v58 }
 0x49d   :  { %1656 = vtanh.f32 %v537_v15  ;;  %v1338_v21 = vmul.f32 -1.442695, %v537_v15 }
 0x49f   :  { %1658 = vpow2.f32 %v1338_v21 }
 0x4a7   :  { %v1657_v19 = vpop.eup %1656 }
 0x4a8   :  { %547 = vrot.lane.b32.xlu1 %v1657_v19, %s1789_s24 }
 0x4a9   :  { %v1659_v23 = vpop.eup %1658 }
 0x4aa   :  { %v541_v24 = vadd.f32 1.0, %v1659_v23 }
 0x4ac   :  { %1660 = vrcp.f32 %v541_v24 }
 0x4b6   :  { %v1661_v25 = vpop.eup %1660 }
 0x4b7   :  { %v545_v28 = vmul.f32 %v1661_v25, %v455_v8 }
 0x51a   :  { %v548_v26 = vpop.permute.xlu1 %547 }
 0x51b   :  { %v550_v27 = vmul.f32 %v1661_v25, %v548_v26 }
 0x51d   :  { %552 = vrot.lane.b32.xlu0 %v550_v27, %s1790_s7 }
 0x58f   :  { %v553_v29 = vpop.permute.xlu0 %552 }
 0x590   :  { %v555_v30 = vadd.f32 %v553_v29, %v545_v28 }
 0x592   :  { %1662 = vtanh.f32 %v555_v30 }
 0x59c   :  { %v1663_v31 = vpop.eup %1662 }
 0x59d   :  { %558 = vrot.lane.b32.xlu1 %v1663_v31, %s1789_s24 }
 0x60f   :  { %v559_v32 = vpop.permute.xlu1 %558 }
 0x610   :  { %v561_v33 = vmul.f32 %v1661_v25, %v559_v32 }
 0x612   :  { %563 = vrot.lane.b32.xlu0 %v561_v33, %s1790_s7 }
 0x684   :  { %v2003_v34 = vpop.permute.xlu0 %563 }
 0x685   :  { %1495 = vmatmul.mubr.msk.f32.vlgmr.msra.gmra.mrb[6].mxu0 %vm359_vm1, %v2003_v34 }
 0x686   :  { %1606 = vmatpush3.bf16.msra.mxu0 %v1923_v16  ;;  %1516 = vmatprep.mubr.msk.f32.mxu0 %vm1787_vm2, %v1788_v22 }
 0x687   :  { %1607 = vmatprep.subr.bf16.mxu0 %v1786_v17 }
 0x68a   :  { %1609 = vmatpush3.bf16.msra.mxu0 %v1935_v20 }
 0x68b   :  { %1616 = vmatprep.subr.bf16.mxu0 %v1786_v17 }
 0x758   :  { %v633_v36 = vpop.f32.mrb[6].mxu0 }
 0x759   :  { %v637_v37 = vadd.f32 %v633_v36, %v325_v35  ;;  %v1496_v38 = vpop.f32.mrb[7].mxu0  ;;  %v340_v35 = vadd.f32 %v1975_v57, %v1968_v50 }
 0x75b   :  { %1664 = vtanh.f32 %v637_v37  ;;  %v1340_v40 = vmul.f32 -1.442695, %v637_v37 }
 0x75d   :  { %1666 = vpow2.f32 %v1340_v40 }
 0x765   :  { %v1665_v39 = vpop.eup %1664 }
 0x766   :  { %647 = vrot.lane.b32.xlu1 %v1665_v39, %s1789_s24 }
 0x767   :  { %v1667_v41 = vpop.eup %1666 }
 0x768   :  { %v641_v42 = vadd.f32 1.0, %v1667_v41 }
 0x76a   :  { %1668 = vrcp.f32 %v641_v42 }
 0x774   :  { %v1669_v43 = vpop.eup %1668 }
 0x775   :  { %v645_v46 = vmul.f32 %v1669_v43, %v555_v30 }
 0x7d8   :  { %v648_v44 = vpop.permute.xlu1 %647 }
 0x7d9   :  { %v650_v45 = vmul.f32 %v1669_v43, %v648_v44  ;;  %v1162_v44 = vld [vmem:[%s2137_s8] sm:$0xff] }
 0x7db   :  { %652 = vrot.lane.b32.xlu0 %v650_v45, %s1790_s7  ;;  %v1163_v45 = vld [vmem:[%s2137_s8 + $0x8] sm:$0xff] }
 0x84d   :  { %v653_v47 = vpop.permute.xlu0 %652 }
 0x84e   :  { %v655_v48 = vadd.f32 %v653_v47, %v645_v46  ;;  %v1628_v46 = vpack.c.bf16 %v1163_v45, %v1162_v44 }
 0x850   :  { %1670 = vtanh.f32 %v655_v48 }
 0x85a   :  { %v1671_v49 = vpop.eup %1670 }
 0x85b   :  { %658 = vrot.lane.b32.xlu1 %v1671_v49, %s1789_s24 }
 0x8cd   :  { %v659_v51 = vpop.permute.xlu1 %658 }
 0x8ce   :  { %v661_v52 = vmul.f32 %v1669_v43, %v659_v51  ;;  %v1164_v51 = vld [vmem:[%s2137_s8 + $0x10] sm:$0xff] }
 0x8d0   :  { %663 = vrot.lane.b32.xlu0 %v661_v52, %s1790_s7  ;;  %v1165_v52 = vld [vmem:[%s2137_s8 + $0x18] sm:$0xff] }
 0x942   :  { %v2019_v53 = vpop.permute.xlu0 %663 }
 0x943   :  { %1506 = vmatmul.mubr.msk.f32.vlgmr.msra.gmra.mrb[14].mxu1 %vm359_vm1, %v2019_v53 }
 0x944   :  { %1612 = vmatpush3.bf16.msra.mxu1 %v1923_v16  ;;  %1527 = vmatprep.mubr.msk.f32.mxu1 %vm1787_vm2, %v1788_v22 }
 0x945   :  { %1613 = vmatprep.subr.bf16.mxu1 %v1786_v17 }
 0x948   :  { %1615 = vmatpush3.bf16.msra.mxu1 %v1935_v20 }
 0x949   :  { %1622 = vmatprep.subr.bf16.mxu1 %v1786_v17 }
 0xa16   :  { %v733_v56 = vpop.f32.mrb[14].mxu1 }
 0xa17   :  { %v737_v59 = vadd.f32 %v733_v56, %v330_v54  ;;  %v1507_v60 = vpop.f32.mrb[15].mxu1  ;;  %v1632_v54 = vpack.c.bf16 %v1165_v52, %v1164_v51 }
 0xa19   :  { %1672 = vtanh.f32 %v737_v59  ;;  %v1342_v0 = vmul.f32 -1.442695, %v737_v59  ;;  %v345_v59 = vadd.f32 %v1968_v50, %v1983_v62 }
 0xa1b   :  { %1674 = vpow2.f32 %v1342_v0 }
 0xa23   :  { %v1673_v63 = vpop.eup %1672 }
 0xa24   :  { %747 = vrot.lane.b32.xlu1 %v1673_v63, %s1789_s24 }
 0xa25   :  { %v1675_v1 = vpop.eup %1674 }
 0xa26   :  { %v741_v2 = vadd.f32 1.0, %v1675_v1 }
 0xa28   :  { %1676 = vrcp.f32 %v741_v2 }
 0xa32   :  { %v1677_v3 = vpop.eup %1676 }
 0xa33   :  { %v745_v6 = vmul.f32 %v1677_v3, %v655_v48 }
 0xa96   :  { %v748_v4 = vpop.permute.xlu1 %747 }
 0xa97   :  { %v750_v5 = vmul.f32 %v1677_v3, %v748_v4 }
 0xa99   :  { %752 = vrot.lane.b32.xlu0 %v750_v5, %s1790_s7 }
 0xb0b   :  { %v753_v7 = vpop.permute.xlu0 %752 }
 0xb0c   :  { %v755_v55 = vadd.f32 %v753_v7, %v745_v6 }
 0xb0e   :  { %1678 = vtanh.f32 %v755_v55 }
 0xb18   :  { %v1679_v8 = vpop.eup %1678 }
 0xb19   :  { %758 = vrot.lane.b32.xlu1 %v1679_v8, %s1789_s24 }
 0xb8b   :  { %v759_v9 = vpop.permute.xlu1 %758 }
 0xb8c   :  { %v761_v10 = vmul.f32 %v1677_v3, %v759_v9 }
 0xb8e   :  { %763 = vrot.lane.b32.xlu0 %v761_v10, %s1790_s7 }
 0xc00   :  { %v2035_v11 = vpop.permute.xlu0 %763 }
 0xc01   :  { %1517 = vmatmul.mubr.msk.f32.vlgmr.msra.gmra.mrb[8].mxu0 %vm359_vm1, %v2035_v11 }
 0xc02   :  { %1618 = vmatpush3.bf16.msra.mxu0 %v1923_v16  ;;  %1538 = vmatprep.mubr.msk.f32.mxu0 %vm1787_vm2, %v1788_v22 }
 0xc03   :  { %1619 = vmatprep.subr.bf16.mxu0 %v1786_v17 }
 0xc06   :  { %1621 = vmatpush3.bf16.msra.mxu0 %v1935_v20 }
 0xc07   :  { %1629 = vmatprep.subr.bf16.mxu0 %v1628_v46 }
 0xcd4   :  { %v833_v14 = vpop.f32.mrb[8].mxu0 }
 0xcd5   :  { %v837_v15 = vadd.f32 %v833_v14, %v335_v13  ;;  %v1518_v18 = vpop.f32.mrb[9].mxu0 }
 0xcd7   :  { %1680 = vtanh.f32 %v837_v15  ;;  %v1344_v21 = vmul.f32 -1.442695, %v837_v15 }
 0xcd9   :  { %1682 = vpow2.f32 %v1344_v21 }
 0xce1   :  { %v1681_v19 = vpop.eup %1680 }
 0xce2   :  { %847 = vrot.lane.b32.xlu1 %v1681_v19, %s1789_s24 }
 0xce3   :  { %v1683_v23 = vpop.eup %1682 }
 0xce4   :  { %v841_v24 = vadd.f32 1.0, %v1683_v23 }
 0xce6   :  { %1684 = vrcp.f32 %v841_v24 }
 0xcf0   :  { %v1685_v25 = vpop.eup %1684 }
 0xcf1   :  { %v845_v28 = vmul.f32 %v1685_v25, %v755_v55 }
 0xd54   :  { %v848_v26 = vpop.permute.xlu1 %847 }
 0xd55   :  { %v850_v27 = vmul.f32 %v1685_v25, %v848_v26 }
 0xd57   :  { %852 = vrot.lane.b32.xlu0 %v850_v27, %s1790_s7 }
 0xdc9   :  { %v853_v29 = vpop.permute.xlu0 %852 }
 0xdca   :  { %v855_v58 = vadd.f32 %v853_v29, %v845_v28 }
 0xdcc   :  { %1686 = vtanh.f32 %v855_v58 }
 0xdd6   :  { %v1687_v30 = vpop.eup %1686 }
 0xdd7   :  { %858 = vrot.lane.b32.xlu1 %v1687_v30, %s1789_s24 }
 0xe49   :  { %v859_v31 = vpop.permute.xlu1 %858 }
 0xe4a   :  { %v861_v32 = vmul.f32 %v1685_v25, %v859_v31 }
 0xe4c   :  { %863 = vrot.lane.b32.xlu0 %v861_v32, %s1790_s7 }
 0xebe   :  { %v864_v33 = vpop.permute.xlu0 %863 }
 0xebf   :  { %1528 = vmatmul.mubr.msk.f32.vlgmr.msra.gmra.mrb[16].mxu1 %vm359_vm1, %v864_v33 }
 0xec0   :  { %1624 = vmatpush3.bf16.msra.mxu1 %v1923_v16  ;;  %1549 = vmatprep.mubr.msk.f32.mxu1 %vm1787_vm2, %v1788_v22 }
 0xec1   :  { %1625 = vmatprep.subr.bf16.mxu1 %v1786_v17 }
 0xec4   :  { %1627 = vmatpush3.bf16.msra.mxu1 %v1935_v20 }
 0xf92   :  { %v933_v36 = vpop.f32.mrb[16].mxu1 }
 0xf93   :  { %v937_v37 = vadd.f32 %v933_v36, %v340_v35  ;;  %v1529_v38 = vpop.f32.mrb[17].mxu1 }
 0xf95   :  { %1688 = vtanh.f32 %v937_v37  ;;  %v1346_v40 = vmul.f32 -1.442695, %v937_v37 }
 0xf97   :  { %1690 = vpow2.f32 %v1346_v40 }
 0xf9f   :  { %v1689_v39 = vpop.eup %1688 }
 0xfa0   :  { %947 = vrot.lane.b32.xlu1 %v1689_v39, %s1789_s24 }
 0xfa1   :  { %v1691_v16 = vpop.eup %1690 }
 0xfa2   :  { %v941_v41 = vadd.f32 1.0, %v1691_v16 }
 0xfa4   :  { %1692 = vrcp.f32 %v941_v41 }
 0xfae   :  { %v1693_v22 = vpop.eup %1692 }
 0xfaf   :  { %v945_v20 = vmul.f32 %v1693_v22, %v855_v58 }
0x1012   :  { %v948_v42 = vpop.permute.xlu1 %947 }
0x1013   :  { %v950_v17 = vmul.f32 %v1693_v22, %v948_v42 }
0x1015   :  { %952 = vrot.lane.b32.xlu0 %v950_v17, %s1790_s7 }
0x1087   :  { %v953_v43 = vpop.permute.xlu0 %952 }
0x1088   :  { %v2060_v57 = vadd.f32 %v953_v43, %v945_v20 }
0x108a   :  { %1694 = vtanh.f32 %v2060_v57 }
0x1094   :  { %v1695_v47 = vpop.eup %1694 }
0x1095   :  { %958 = vrot.lane.b32.xlu1 %v1695_v47, %s1789_s24 }
0x1107   :  { %v959_v48 = vpop.permute.xlu1 %958 }
0x1108   :  { %v961_v49 = vmul.f32 %v1693_v22, %v959_v48 }
0x110a   :  { %963 = vrot.lane.b32.xlu0 %v961_v49, %s1790_s7 }
0x117c   :  { %v964_v56 = vpop.permute.xlu0 %963 }
0x117d   :  { %1539 = vmatmul.mubr.msk.f32.vlgmr.msra.gmra.mrb[10].mxu0 %vm359_vm1, %v964_v56 }
0x117e   :  { %1631 = vmatpush3.bf16.msra.mxu0 %v1628_v46  ;;  %1560 = vmatprep.mubr.msk.f32.mxu0 %vm359_vm1, %v1988_v12 }
0x117f   :  { %1633 = vmatprep.subr.bf16.mxu0 %v1632_v54 }
0x1182   :  { %1635 = vmatpush3.bf16.msra.mxu0 %v1632_v54 }
0x1185   :  { %1561 = vmatmul.mubr.msk.f32.vlgmr.msra.gmra.mrb[12].mxu0 %vm359_vm1, %v2003_v34  ;;  %v2093_v34 = vld [vmem:[%s2138_s9] ss:$0 sm:$0xff]  ;;  %s1791_s9 = smov [#allocation7]  }
0x1186   :  { %1563 = vmatprep.mubr.msk.f32.mxu0 %vm359_vm1, %v2019_v53  ;;  %s1304_s13 = sshll.u32 %s1791_s9, 4  ;;  %s1305_s13 = int_to_ptr.vmem [resolvable:$true] %s1304_s13 }
0x1187   :  { %s1756_s5 = scalar_lea.vmem %s1305_s13, 1024  ;;  %p1761_p3 = scmp.lt.s32.totalorder %s1305_s13, %s1305_s13 }
0x1188   :  { %p1757_p2 = scmp.ne.s32.totalorder %s1305_s13, %s1756_s5  ;;  %p1762_p4 = scmp.lt.s32.totalorder %s1756_s5, %s1756_s5 }
0x1189   :  { %1564 = vmatmul.mubr.msk.f32.gmra.mrb[14].mxu0 %vm359_vm1, %v2035_v11 }
0x118a   :  { %1566 = vmatprep.mubr.msk.f32.mxu0 %vm359_vm1, %v864_v33  ;;  %v350_v33 = vadd.f32 %v1981_v61, %v1968_v50  ;;  %p1763_p5 = por %p1762_p4, %p1761_p3 }
0x118c   :  { %p1764_p6 = pnand %p1763_p5, %p1757_p2 }
0x118d   :  { %1567 = vmatmul.mubr.msk.f32.gmra.mrb[16].mxu0 %vm359_vm1, %v964_v56 }
0x1250   :  { %v1033_v60 = vpop.f32.mrb[10].mxu0 }
0x1251   :  { %v1037_v12 = vadd.f32 %v1033_v60, %v345_v59  ;;  %v1540_v63 = vpop.f32.mrb[11].mxu0 }
0x1253   :  { %1696 = vtanh.f32 %v1037_v12  ;;  %v1348_v19 = vmul.f32 -1.442695, %v1037_v12 }
0x1255   :  { %1698 = vpow2.f32 %v1348_v19 }
0x1258   :  { %v1562_v53 = vpop.f32.mrb[12].mxu0 }
0x1259   :  { %v1250_v0 = vadd.f32 %v1562_v53, %v2093_v34  ;;  %v1244_v1 = vpop.f32.mrb[13].mxu0 }
0x125a   :  { %v1245_v2 = vadd.f32 %v2093_v34, %v1244_v1 }
0x125b   :  { %v1284_v3 = vmax.f32 %v1250_v0, 0.0 }
0x125c   :  { %v1283_v4 = vmax.f32 %v1245_v2, 0.0  ;;  %v1565_v5 = vpop.f32.mrb[14].mxu0 }
0x125d   :  { %v1697_v6 = vpop.eup %1696  ;;  %1292 = vst [vmem:[#allocation7 + $0x8] sm:$0xff] %v1284_v3  ;;  %v1260_v62 = vadd.f32 %v1565_v5, %v2093_v34  ;;  %v1254_v7 = vpop.f32.mrb[15].mxu0 }
0x125e   :  { %1291 = vst [vmem:[#allocation7] sm:$0xff] %v1283_v4  ;;  %v1255_v55 = vadd.f32 %v2093_v34, %v1254_v7  ;;  %1047 = vrot.lane.b32.xlu1 %v1697_v6, %s1789_s24 }
0x125f   :  { %v1286_v8 = vmax.f32 %v1260_v62, 0.0  ;;  %v1699_v21 = vpop.eup %1698 }
0x1260   :  { %v1285_v9 = vmax.f32 %v1255_v55, 0.0  ;;  %v1568_v10 = vpop.f32.mrb[16].mxu0  ;;  %v1041_v23 = vadd.f32 1.0, %v1699_v21 }
0x1261   :  { %1294 = vst [vmem:[#allocation7 + $0x18] sm:$0xff] %v1286_v8  ;;  %v1270_v11 = vadd.f32 %v1568_v10, %v2093_v34  ;;  %v1264_v13 = vpop.f32.mrb[17].mxu0 }
0x1262   :  { %1293 = vst [vmem:[#allocation7 + $0x10] sm:$0xff] %v1285_v9  ;;  %v1265_v14 = vadd.f32 %v2093_v34, %v1264_v13  ;;  %1700 = vrcp.f32 %v1041_v23 }
0x1263   :  { %v1288_v15 = vmax.f32 %v1270_v11, 0.0 }
0x1264   :  { %v1287_v18 = vmax.f32 %v1265_v14, 0.0 }
0x1265   :  { %1296 = vst [vmem:[#allocation7 + $0x28] sm:$0xff] %v1288_v15 }
0x1266   :  { %1295 = vst [vmem:[#allocation7 + $0x20] sm:$0xff] %v1287_v18 }
0x126c   :  { %v1701_v24 = vpop.eup %1700 }
0x126d   :  { %v1045_v27 = vmul.f32 %v1701_v24, %v2060_v57 }
0x12d0   :  { %v1048_v25 = vpop.permute.xlu1 %1047 }
0x12d1   :  { %v1050_v26 = vmul.f32 %v1701_v24, %v1048_v25 }
0x12d3   :  { %1052 = vrot.lane.b32.xlu0 %v1050_v26, %s1790_s7 }
0x1345   :  { %v1053_v28 = vpop.permute.xlu0 %1052 }
0x1346   :  { %v1055_v29 = vadd.f32 %v1053_v28, %v1045_v27 }
0x1348   :  { %1702 = vtanh.f32 %v1055_v29 }
0x1352   :  { %v1703_v58 = vpop.eup %1702 }
0x1353   :  { %1058 = vrot.lane.b32.xlu1 %v1703_v58, %s1789_s24 }
0x13c5   :  { %v1059_v30 = vpop.permute.xlu1 %1058 }
0x13c6   :  { %v1061_v31 = vmul.f32 %v1701_v24, %v1059_v30 }
0x13c8   :  { %1063 = vrot.lane.b32.xlu0 %v1061_v31, %s1790_s7 }
0x143a   :  { %v1064_v32 = vpop.permute.xlu0 %1063 }
0x143b   :  { %1550 = vmatmul.mubr.msk.f32.vlgmr.msra.gmra.mrb[18].mxu1 %vm359_vm1, %v1064_v32  ;;  %1569 = vmatprep.mubr.msk.f32.mxu0 %vm359_vm1, %v1064_v32 }
0x150e   :  { %v1133_v35 = vpop.f32.mrb[18].mxu1 }
0x150f   :  { %v1137_v36 = vadd.f32 %v1133_v35, %v350_v33  ;;  %v1551_v37 = vpop.f32.mrb[19].mxu1 }
0x1511   :  { %1704 = vtanh.f32 %v1137_v36  ;;  %v1350_v39 = vmul.f32 -1.442695, %v1137_v36 }
0x1513   :  { %1706 = vpow2.f32 %v1350_v39 }
0x151b   :  { %v1705_v38 = vpop.eup %1704 }
0x151c   :  { %1147 = vrot.lane.b32.xlu1 %v1705_v38, %s1789_s24 }
0x151d   :  { %v1707_v40 = vpop.eup %1706 }
0x151e   :  { %v1141_v16 = vadd.f32 1.0, %v1707_v40 }
0x1520   :  { %1708 = vrcp.f32 %v1141_v16 }
0x152a   :  { %v1709_v41 = vpop.eup %1708 }
0x152b   :  { %v1145_v17 = vmul.f32 %v1709_v41, %v1055_v29 }
0x158e   :  { %v1148_v22 = vpop.permute.xlu1 %1147 }
0x158f   :  { %v1150_v42 = vmul.f32 %v1709_v41, %v1148_v22 }
0x1591   :  { %1152 = vrot.lane.b32.xlu0 %v1150_v42, %s1790_s7 }
0x1603   :  { %v1153_v20 = vpop.permute.xlu0 %1152 }
0x1604   :  { %v1155_v50 = vadd.f32 %v1153_v20, %v1145_v17 }
0x1606   :  { %1710 = vtanh.f32 %v1155_v50 }
0x1610   :  { %v1711_v61 = vpop.eup %1710 }
0x1611   :  { %1158 = vrot.lane.b32.xlu1 %v1711_v61, %s1789_s24 }
0x1683   :  { %v1159_v43 = vpop.permute.xlu1 %1158 }
0x1684   :  { %v1161_v57 = vmul.f32 %v1709_v41, %v1159_v43 }
0x1686   :  { %1174 = vrot.lane.b32.xlu0 %v1161_v57, %s1790_s7 }
0x16f8   :  { %v1175_v44 = vpop.permute.xlu0 %1174 }
0x16f9   :  { %1570 = vmatmul.mubr.msk.f32.gmra.mrb[18].mxu0 %vm359_vm1, %v1175_v44 }
0x17cc   :  { %v1571_v45 = vpop.f32.mrb[18].mxu0 }
0x17cd   :  { %v1280_v46 = vadd.f32 %v1571_v45, %v2093_v34  ;;  %v1274_v47 = vpop.f32.mrb[19].mxu0 }
0x17ce   :  { %v1275_v48 = vadd.f32 %v2093_v34, %v1274_v47 }
0x17cf   :  { %v1290_v49 = vmax.f32 %v1280_v46, 0.0 }
0x17d0   :  { %v1289_v51 = vmax.f32 %v1275_v48, 0.0 }
0x17d1   :  { %1298 = vst [vmem:[#allocation7 + $0x38] sm:$0xff] %v1290_v49 }
0x17d2   :  { %1297 = vst [vmem:[#allocation7 + $0x30] sm:$0xff] %v1289_v51 }
0x17d3   :  { %1767 = shalt.err (!%p1764_p6)
}
0x17d4   :  { %s1768_s14 = scalar_lea.hbm %s2139_s10, 1024 }
0x17d5   :  { %p1769_p7 = scmp.ne.s32.totalorder %s2139_s10, %s1768_s14  ;;  %p1772_p8 = scmp.lt.u32.totalorder %s1768_s14, %s2139_s10 }
0x17d7   :  { %p1774_p9 = pnand %p1772_p8, %p1769_p7 }
0x17d9   :  { %1777 = shalt.err (!%p1774_p9)
}
0x17da   :  { %s1792_s0 = smov 128   ;;  %s1793_s21 = smov 8  }
0x17db   :  { %1310 = dma.vmem_to_hbm [thread:$0]  %s1305_s13, 1024, %s2139_s10, [#allocation4], %s1792_s0, %s1792_s0, %s1793_s21  }
0x17dc   :  { %1782 = dma.done.wait [#allocation4], 1024  }
0x17dd   :  { %1783 = vsyncadd [#allocation4], 4294966272 }
0x17de   :  { %1314 = vsyncpa [#allocation3], 1 }
0x17df   :  { %1315 = vsyncpa [#allocation6], 1 }
0x17e0   :  { %1316 = vsyncpa [#allocation4], 1 }

</bundles_post_ra>
